<compile_context>
chip_gen: v6e
topology: v6e:2x2x1
jax: 0.10.0
libtpu: 0.0.40
codegen_flags: <defaults>
</compile_context>

<pallas_src>
import jax
import jax.numpy as jnp
from jax.experimental import pallas as pl
from jax.experimental.pallas import tpu as pltpu

# ---- small, module-consistent shapes ----
B = 2                      # batch
VIEWS = 4                  # args.views (n)
C, H, W = 3, 16, 16
NPTS = 64                  # points per cloud
FEAT_IN = C * H * W        # 768 (flattened depth image)
FEAT_IN_AUG = FEAT_IN + 128  # 896: +1 bias column, rest zero (keeps lanes dense)
D = 32                     # visual feature dim (CLIP embed dim stand-in)
D_PAD = 128                # lane-dense padded feature dim
P = 16                     # feats_p projection dim
K = 8                      # number of prompt classes
KPAD = 128                 # lane-dense padded logits width


# --------------------------- Pallas kernel -----------------------------------

def fused_cil_kernel(x_ref, w_ref, m_ref, o_ref):
    # x_ref : (B, FEAT_IN_AUG)      bf16  -- view-summed images + constant-1 bias col
    # w_ref : (FEAT_IN_AUG, D_PAD)  bf16  -- (w_pre + w_ori) padded, bias row folded in
    # m_ref : (D_PAD, KPAD)         bf16  -- feats_p @ feats_p.T @ prompts.T, zero-padded
    # o_ref : (B, KPAD)             f32   -- padded logits (lane-dense store)
    #
    # TODO(synk): CLIP ViT visual towers approximated by one linear projection
    # (flattened NCHW depth image -> D features); weights are synthetic.
    f = jnp.dot(x_ref[...], w_ref[...],
                preferred_element_type=jnp.float32)            # (B, D_PAD) f32 acc
    # L2 normalize (padded lanes are exactly 0 -> exact norm); rsqrt -> EUP slot
    nsq = jnp.sum(f * f, axis=-1, keepdims=True)
    f = f * jax.lax.rsqrt(nsq + 1e-12)
    # single precomputed head matmul, bf16 inputs -> one MXU pass, f32 accumulate
    o_ref[...] = jnp.dot(f.astype(jnp.bfloat16), m_ref[...],
                         preferred_element_type=jnp.float32)   # (B, KPAD)


# --------------------------- pallas_call wrapper ------------------------------

def run_fused(x_aug_bf16, w_aug_bf16, head_pad_bf16):
    b, f_in = x_aug_bf16.shape
    d = w_aug_bf16.shape[1]
    kpad = head_pad_bf16.shape[1]
    flops = 2 * b * f_in * d + 2 * b * d * kpad
    bytes_accessed = (x_aug_bf16.size * 2 + w_aug_bf16.size * 2 +
                      head_pad_bf16.size * 2 + b * kpad * 4)
    # No grid: single invocation, whole arrays resident in VMEM (footprint ~230 KB).
    return pl.pallas_call(
        fused_cil_kernel,
        out_shape=jax.ShapeDtypeStruct((b, kpad), jnp.float32),
        cost_estimate=pl.CostEstimate(flops=flops,
                                      transcendentals=b,
                                      bytes_accessed=bytes_accessed),
    )(x_aug_bf16, w_aug_bf16, head_pad_bf16)


# --------------------------- call-invariant prep ------------------------------

def prepare_head(params, prompts_feats, feats_p=None):
    """Fold encoders + bias + head once per parameter set (hoisted off the
    per-call path)."""
    w_sum = params["w_pre"] + params["w_ori"]                    # (F, D)
    b_eff = float(VIEWS) * (params["b_pre"] + params["b_ori"])   # (1, D)

    w_aug = jnp.zeros((FEAT_IN_AUG, D_PAD), jnp.float32)
    w_aug = w_aug.at[:FEAT_IN, :D].set(w_sum)
    w_aug = w_aug.at[FEAT_IN, :D].set(b_eff[0])                  # bias row

    if feats_p is None:
        head = prompts_feats.T                                   # (D, K)
    else:
        head = feats_p @ (feats_p.T @ prompts_feats.T)           # (D, K)
    k = head.shape[1]
    head_pad = jnp.zeros((D_PAD, KPAD), jnp.float32)
    head_pad = head_pad.at[:D, :k].set(head)

    return w_aug.astype(jnp.bfloat16), head_pad.astype(jnp.bfloat16)


# --------------------------- plain-JAX glue ----------------------------------

def simple_renderer(points):
    # TODO(synk): learned Selector(views, 0) not reproduced; fixed equispaced
    # azimuths, zero elevation, unit distance (deterministic).
    # TODO(synk): differentiable point Renderer(points_radius=0.02) replaced by
    # a simple orthographic depth rasterizer (one batched scatter-max).
    b = points.shape[0]
    azim = jnp.linspace(0.0, 2.0 * jnp.pi, VIEWS, endpoint=False)
    dist = jnp.ones((VIEWS,), jnp.float32)
    ca = jnp.cos(azim)[None, :, None]                        # (1, V, 1)
    sa = jnp.sin(azim)[None, :, None]
    px = points[:, None, :, 0]                               # (B, 1, N)
    py = points[:, None, :, 1]
    pz = points[:, None, :, 2]
    x = px * ca + pz * sa                                    # (B, V, N)
    y = jnp.broadcast_to(py, x.shape)
    z = -px * sa + pz * ca
    ix = jnp.clip(((x + 1.0) * 0.5 * (W - 1)).astype(jnp.int32), 0, W - 1)
    iy = jnp.clip(((y + 1.0) * 0.5 * (H - 1)).astype(jnp.int32), 0, H - 1)
    depth = (z + 1.0) * 0.5 * dist[None, :, None]
    img = jnp.zeros((b, VIEWS, H, W), jnp.float32)
    b_idx = jnp.arange(b)[:, None, None]
    v_idx = jnp.arange(VIEWS)[None, :, None]
    img = img.at[b_idx, v_idx, iy, ix].max(depth)            # batched scatter-max
    return img                                               # (B, V, H, W)


@jax.jit
def zero_shot_cil_forward(points, w_aug_bf16, head_pad_bf16):
    # TODO(synk): tv.save_image('./depco.png') side effect omitted (no file IO).
    imgs = simple_renderer(points)                                   # (b, n, h, w)
    b = imgs.shape[0]
    imgs = jnp.broadcast_to(imgs[:, :, None], (b, VIEWS, C, H, W))   # depth -> 3ch
    x = imgs.reshape(b, VIEWS, FEAT_IN).astype(jnp.float32)
    # By linearity of the folded encoder, sum views BEFORE the matmul.
    x_sum = jnp.sum(x, axis=1)                                       # (b, F)
    # Append constant-1 bias column + zero padding (keeps lanes dense at 896).
    ones = jnp.ones((b, 1), jnp.float32)
    zpad = jnp.zeros((b, FEAT_IN_AUG - FEAT_IN - 1), jnp.float32)
    x_aug = jnp.concatenate([x_sum, ones, zpad], axis=1)             # (b, F_AUG)

    logits_pad = run_fused(x_aug.astype(jnp.bfloat16),
                           w_aug_bf16, head_pad_bf16)                # (b, KPAD)
    return logits_pad[:, :K]                                         # (b, K)


if __name__ == "__main__":
    key = jax.random.PRNGKey(0)
    k1, k2, k3, k4, k5, k6, k7 = jax.random.split(key, 7)
    points = jax.random.uniform(k1, (B, NPTS, 3), jnp.float32, -1.0, 1.0)
    prompts_feats = jax.random.normal(k2, (K, D), jnp.float32)
    prompts_feats = prompts_feats / jnp.linalg.norm(prompts_feats, axis=-1,
                                                    keepdims=True)
    feats_p = jax.random.normal(k3, (D, P), jnp.float32) * 0.1
    params = dict(
        w_pre=jax.random.normal(k4, (FEAT_IN, D), jnp.float32) * 0.02,
        b_pre=jax.random.normal(k5, (1, D), jnp.float32) * 0.01,
        w_ori=jax.random.normal(k6, (FEAT_IN, D), jnp.float32) * 0.02,
        b_ori=jax.random.normal(k7, (1, D), jnp.float32) * 0.01,
    )

    # feats_p branch
    w_aug, head_pad = prepare_head(params, prompts_feats, feats_p)
    out = zero_shot_cil_forward(points, w_aug, head_pad)
    out = jax.block_until_ready(out)
    assert out.shape == (B, K) and out.dtype == jnp.float32
    assert bool(jnp.all(jnp.isfinite(out)))

    # feats_p=None branch (same jitted forward, different prepared head)
    w_aug2, head_pad2 = prepare_head(params, prompts_feats, None)
    out2 = zero_shot_cil_forward(points, w_aug2, head_pad2)
    out2 = jax.block_until_ready(out2)
    assert out2.shape == (B, K) and out2.dtype == jnp.float32
    assert bool(jnp.all(jnp.isfinite(out2)))

    print("KERNEL_OK")
</pallas_src>

<mosaic_0001>
module attributes {stable_mosaic.version = 11 : i64} {
  func.func private @main(%arg0: i32) attributes {dimension_semantics = [#tpu.dimension_semantics<core_parallel>], iteration_bounds = array<i64: 2>, tpu.core_type = #tpu.core_type<sc_scalar_subcore>, window_params = []} {
    return
  }
}

module attributes {stable_mosaic.version = 11 : i64} {
  func.func private @main(%arg0: i32) attributes {dimension_semantics = [#tpu.dimension_semantics<core_parallel>], iteration_bounds = array<i64: 2>, tpu.core_type = #tpu.core_type<sc_scalar_subcore>, window_params = []} {
    return
  }
}

module attributes {stable_mosaic.version = 11 : i64} {
  func.func @fused_cil_kernel(%arg0: memref<2x896xbf16, #tpu.memory_space<vmem>>, %arg1: memref<896x128xbf16, #tpu.memory_space<vmem>>, %arg2: memref<128x128xbf16, #tpu.memory_space<vmem>>, %arg3: memref<2x128xf32, #tpu.memory_space<vmem>>) attributes {dimension_semantics = [], scalar_prefetch = 0 : i64, scratch_operands = 0 : i64, tpu.core_type = #tpu.core_type<tc>} {
    %c0 = arith.constant 0 : index
    %c0_0 = arith.constant 0 : index
    %0 = vector.load %arg0[%c0, %c0_0] : memref<2x896xbf16, #tpu.memory_space<vmem>>, vector<2x896xbf16>
    %c0_1 = arith.constant 0 : index
    %c0_2 = arith.constant 0 : index
    %1 = vector.load %arg1[%c0_1, %c0_2] : memref<896x128xbf16, #tpu.memory_space<vmem>>, vector<896x128xbf16>
    %cst = arith.constant dense<0.000000e+00> : vector<2x128xf32>
    %2 = tpu.matmul %0, %1, %cst {dimension_numbers = #tpu.dot_dimension_numbers<[1], [0], [0], [1], [0, 0, 1, 1], [], []>} : vector<2x896xbf16>, vector<896x128xbf16>, vector<2x128xf32> -> vector<2x128xf32>
    %3 = arith.mulf %2, %2 : vector<2x128xf32>
    %cst_3 = arith.constant dense<0.000000e+00> : vector<2xf32>
    %4 = vector.multi_reduction <add>, %3, %cst_3 [1] : vector<2x128xf32> to vector<2xf32>
    %5 = vector.shape_cast %4 : vector<2xf32> to vector<2x1xf32>
    %cst_4 = arith.constant 9.99999996E-13 : f32
    %6 = vector.broadcast %cst_4 : f32 to vector<2x1xf32>
    %7 = arith.addf %5, %6 : vector<2x1xf32>
    %8 = math.rsqrt %7 : vector<2x1xf32>
    %9 = vector.broadcast %8 : vector<2x1xf32> to vector<2x128xf32>
    %10 = arith.mulf %2, %9 : vector<2x128xf32>
    %11 = arith.truncf %10 : vector<2x128xf32> to vector<2x128xbf16>
    %c0_5 = arith.constant 0 : index
    %c0_6 = arith.constant 0 : index
    %12 = vector.load %arg2[%c0_5, %c0_6] : memref<128x128xbf16, #tpu.memory_space<vmem>>, vector<128x128xbf16>
    %cst_7 = arith.constant dense<0.000000e+00> : vector<2x128xf32>
    %13 = tpu.matmul %11, %12, %cst_7 {dimension_numbers = #tpu.dot_dimension_numbers<[1], [0], [0], [1], [0, 0, 1, 1], [], []>} : vector<2x128xbf16>, vector<128x128xbf16>, vector<2x128xf32> -> vector<2x128xf32>
    %c0_8 = arith.constant 0 : index
    %c0_9 = arith.constant 0 : index
    %14 = vector.load %arg3[%c0_8, %c0_9] : memref<2x128xf32, #tpu.memory_space<vmem>>, vector<2x128xf32>
    tpu.vector_store %arg3[%c0_8, %c0_9], %13 {strides = array<i32>} : memref<2x128xf32, #tpu.memory_space<vmem>>, vector<2x128xf32>,
    return
  }
}

</mosaic_0001>

<bundles_post_ra>
// kernel: zero_shot_cil_forward.1
= control target key start
LH: loop header
LB: loop body
LE: loop exit
PB: predicated region body
PF: predicated region fallthrough
CT: control target
= control target key end

     0   :  { %v134_v30 = vlaneseq  ;;  %v1090_v33 = vmov 1966171168   ;;  %v1091_v38 = vmov 0.0   ;;  %vm1092_vm0 = vmmov 0   ;;  %s1345_s0 = inlined_call_operand.vmem [shape: bf16[2,896], index: 0, kind: input, shape index: {}]   ;;  %s1346_s1 = inlined_call_operand.vmem [shape: bf16[896,128], index: 1, kind: input, shape index: {}]   ;;  %s1347_s2 = inlined_call_operand.vmem [shape: bf16[128,128], index: 2, kind: input, shape index: {}]   ;;  %s1348_s3 = inlined_call_operand.hbm [shape: f32[2,128], index: 3, kind: output, shape index: {}]  }
   0x1   :  { %v1001_v0 = vld [vmem:[%s1346_s1 + $0x78] sm:$0xff]   ;;  %v1005_v4 = vld [vmem:[%s1346_s1 + $0x70] sm:$0xff]   ;;  %v1009_v8 = vld [vmem:[%s1346_s1 + $0x68] sm:$0xff]   ;;  %v132_v34 = vunpack.c.l.s4 %v1090_v33 }
   0x2   :  { %v1002_v1 = vld [vmem:[%s1346_s1 + $0xf8] sm:$0xff]   ;;  %873 = vmatprep.subr.bf16.mxu0 %v1001_v0  ;;  %v1006_v5 = vld [vmem:[%s1346_s1 + $0xf0] sm:$0xff]   ;;  %v1010_v9 = vld [vmem:[%s1346_s1 + $0xe8] sm:$0xff]   ;;  %v135_v35 = vshrl.u32 %v134_v30, 7 }
   0x3   :  { %v1003_v2 = vld [vmem:[%s1346_s1 + $0x38] sm:$0xff]   ;;  %895 = vmatprep.subr.bf16.mxu1 %v1002_v1  ;;  %v1007_v6 = vld [vmem:[%s1346_s1 + $0x30] sm:$0xff]   ;;  %v1011_v10 = vld [vmem:[%s1346_s1 + $0x28] sm:$0xff]   ;;  %v133_v40 = vunpack.c.0.s8 %v132_v34 }
   0x4   :  { %v1004_v3 = vld [vmem:[%s1346_s1 + $0xb8] sm:$0xff]   ;;  %874 = vmatpush3.bf16.msra.mxu0 %v1003_v2  ;;  %v1008_v7 = vld [vmem:[%s1346_s1 + $0xb0] sm:$0xff]   ;;  %v1012_v11 = vld [vmem:[%s1346_s1 + $0xa8] sm:$0xff]  }
   0x5   :  { %896 = vmatpush3.bf16.msra.mxu1 %v1004_v3  ;;  %875 = vmatprep.subr.bf16.mxu0 %v1005_v4  ;;  %v1013_v12 = vld [vmem:[%s1346_s1 + $0x60] sm:$0xff]   ;;  %v1017_v16 = vld [vmem:[%s1346_s1 + $0x58] sm:$0xff]   ;;  %v1021_v20 = vld [vmem:[%s1346_s1 + $0x50] sm:$0xff]   ;;  %v1217_v41 = vsub.s32 %v133_v40, %v135_v35 }
   0x6   :  { %897 = vmatprep.subr.bf16.mxu1 %v1006_v5  ;;  %v1014_v13 = vld [vmem:[%s1346_s1 + $0xe0] sm:$0xff]   ;;  %v1018_v17 = vld [vmem:[%s1346_s1 + $0xd8] sm:$0xff]   ;;  %v1022_v21 = vld [vmem:[%s1346_s1 + $0xd0] sm:$0xff]  }
   0x7   :  { %v1015_v14 = vld [vmem:[%s1346_s1 + $0x20] sm:$0xff]   ;;  %v1019_v18 = vld [vmem:[%s1346_s1 + $0x18] sm:$0xff]   ;;  %v1023_v22 = vld [vmem:[%s1346_s1 + $0x10] sm:$0xff]  }
   0x8   :  { %876 = vmatpush3.bf16.msra.mxu0 %v1007_v6  ;;  %v1016_v15 = vld [vmem:[%s1346_s1 + $0xa0] sm:$0xff]   ;;  %v1020_v19 = vld [vmem:[%s1346_s1 + $0x98] sm:$0xff]   ;;  %v1024_v23 = vld [vmem:[%s1346_s1 + $0x90] sm:$0xff]  }
   0x9   :  { %898 = vmatpush3.bf16.msra.mxu1 %v1008_v7  ;;  %877 = vmatprep.subr.bf16.mxu0 %v1009_v8  ;;  %v1025_v24 = vld [vmem:[%s1346_s1 + $0x48] sm:$0xff]   ;;  %v1029_v28 = vld [vmem:[%s1346_s1 + $0x40] sm:$0xff]   ;;  %v1034_v36 = vld [vmem:[%s1346_s1 + $0x178] sm:$0xff]  }
   0xa   :  { %899 = vmatprep.subr.bf16.mxu1 %v1010_v9  ;;  %v1026_v25 = vld [vmem:[%s1346_s1 + $0xc8] sm:$0xff]   ;;  %v1030_v29 = vld [vmem:[%s1346_s1 + $0xc0] sm:$0xff]   ;;  %v1035_v48 = vld [vmem:[%s1346_s1 + $0x138] sm:$0xff]  }
   0xb   :  { %v1027_v26 = vld [vmem:[%s1346_s1 + $0x8] sm:$0xff]   ;;  %v1031_v31 = vld [vmem:[%s1346_s1] sm:$0xff]   ;;  %v1037_v50 = vld [vmem:[%s1346_s1 + $0x170] sm:$0xff]  }
   0xc   :  { %878 = vmatpush3.bf16.msra.mxu0 %v1011_v10  ;;  %v1028_v27 = vld [vmem:[%s1346_s1 + $0x88] sm:$0xff]   ;;  %v1032_v32 = vld [vmem:[%s1346_s1 + $0x80] sm:$0xff]   ;;  %v1036_v52 = vld [vmem:[%s1346_s1 + $0x1b8] sm:$0xff]  }
   0xd   :  { %900 = vmatpush3.bf16.msra.mxu1 %v1012_v11  ;;  %879 = vmatprep.subr.bf16.mxu0 %v1013_v12  ;;  %v16_v37 = vld [vmem:[%s1345_s0] sm:$0x7f]  ;;  %v1038_v54 = vld [vmem:[%s1346_s1 + $0x130] sm:$0xff]   ;;  %v1040_v55 = vld [vmem:[%s1346_s1 + $0x168] sm:$0xff]  }
   0xe   :  { %901 = vmatprep.subr.bf16.mxu1 %v1014_v13  ;;  %v130_v39 = vcombine.high %v16_v37, %v16_v37  ;;  %v137_v42 = vrot.slane %v16_v37, %v1217_v41  ;;  %v1039_v56 = vld [vmem:[%s1346_s1 + $0x1b0] sm:$0xff]   ;;  %v1041_v57 = vld [vmem:[%s1346_s1 + $0x128] sm:$0xff]   ;;  %v1043_v58 = vld [vmem:[%s1346_s1 + $0x160] sm:$0xff]  }
   0xf   :  { %v1042_v59 = vld [vmem:[%s1346_s1 + $0x1a8] sm:$0xff]   ;;  %v1044_v60 = vld [vmem:[%s1346_s1 + $0x120] sm:$0xff]   ;;  %v1046_v62 = vld [vmem:[%s1346_s1 + $0x158] sm:$0xff]  }
  0x10   :  { %880 = vmatpush3.bf16.msra.mxu0 %v1015_v14  ;;  %v1221_v43 = vrot.slane %v130_v39, %v1217_v41  ;;  %v145_v44 = vcombine.high %v137_v42, %v137_v42  ;;  %v153_v45 = vrot.slane %v137_v42, %v1217_v41  ;;  %v1045_v61 = vld [vmem:[%s1346_s1 + $0x1a0] sm:$0xff]   ;;  %v1047_v63 = vld [vmem:[%s1346_s1 + $0x118] sm:$0xff]   ;;  %v1049_v0 = vld [vmem:[%s1346_s1 + $0x150] sm:$0xff]  }
  0x11   :  { %902 = vmatpush3.bf16.msra.mxu1 %v1016_v15  ;;  %881 = vmatprep.subr.bf16.mxu0 %v1017_v16  ;;  %v1048_v1 = vld [vmem:[%s1346_s1 + $0x198] sm:$0xff]  }
  0x12   :  { %903 = vmatprep.subr.bf16.mxu1 %v1018_v17  ;;  %v146_v46 = vcombine.high %v1221_v43, %v1221_v43  ;;  %v167_v47 = vrot.slane %v145_v44, %v1217_v41  ;;  %v175_v49 = vcombine.high %v153_v45, %v153_v45 }
  0x14   :  { %882 = vmatpush3.bf16.msra.mxu0 %v1019_v18  ;;  %553 = vmatprep.mubr.bf16.mxu0 %v167_v47  ;;  %v177_v51 = vcombine.high %v167_v47, %v167_v47  ;;  %v174_v53 = vrot.slane %v146_v46, %v1217_v41 }
  0x15   :  { %904 = vmatpush3.bf16.msra.mxu1 %v1020_v19  ;;  %883 = vmatprep.subr.bf16.mxu0 %v1021_v20 }
  0x16   :  { %905 = vmatprep.subr.bf16.mxu1 %v1022_v21  ;;  %593 = vmatprep.mubr.bf16.mxu1 %v177_v51 }
  0x18   :  { %884 = vmatpush3.bf16.msra.mxu0 %v1023_v22 }
  0x19   :  { %906 = vmatpush3.bf16.msra.mxu1 %v1024_v23  ;;  %885 = vmatprep.subr.bf16.mxu0 %v1025_v24 }
  0x1a   :  { %907 = vmatprep.subr.bf16.mxu1 %v1026_v25 }
  0x1c   :  { %886 = vmatpush3.bf16.msra.mxu0 %v1027_v26 }
  0x1d   :  { %908 = vmatpush3.bf16.msra.mxu1 %v1028_v27  ;;  %887 = vmatprep.subr.bf16.mxu0 %v1029_v28 }
  0x1e   :  { %909 = vmatprep.subr.bf16.mxu1 %v1030_v29 }
  0x20   :  { %888 = vmatpush3.bf16.msra.mxu0 %v1031_v31 }
  0x21   :  { %910 = vmatpush3.bf16.msra.mxu1 %v1032_v32  ;;  %917 = vmatprep.subr.bf16.mxu0 %v1034_v36 }
  0x22   :  { %957 = vmatprep.subr.bf16.mxu1 %v1091_v38 }
  0x23   :  { %554 = vmatmul.mubr.bf16.vlgmr.msra.gmra.mxu0 %v153_v45 }
  0x24   :  { %918 = vmatpush3.bf16.msra.mxu0 %v1035_v48  ;;  %594 = vmatmul.mubr.bf16.vlgmr.msra.gmra.mxu1 %v175_v49 }
  0x25   :  { %919 = vmatprep.subr.bf16.mxu0 %v1037_v50  ;;  %958 = vmatpush3.bf16.msra.mxu1 %v1036_v52 }
  0x26   :  { %633 = vmatprep.mubr.bf16.mxu0 %v174_v53  ;;  %959 = vmatprep.subr.bf16.mxu1 %v1091_v38 }
  0x27   :  { %973 = vmatprep.mubr.msk.bf16.mxu1 %vm1092_vm0, %v1091_v38 }
  0x28   :  { %920 = vmatpush3.bf16.msra.mxu0 %v1038_v54 }
  0x29   :  { %921 = vmatprep.subr.bf16.mxu0 %v1040_v55  ;;  %960 = vmatpush3.bf16.msra.mxu1 %v1039_v56 }
  0x2a   :  { %961 = vmatprep.subr.bf16.mxu1 %v1091_v38 }
  0x2c   :  { %922 = vmatpush3.bf16.msra.mxu0 %v1041_v57 }
  0x2d   :  { %923 = vmatprep.subr.bf16.mxu0 %v1043_v58  ;;  %962 = vmatpush3.bf16.msra.mxu1 %v1042_v59 }
  0x2e   :  { %963 = vmatprep.subr.bf16.mxu1 %v1091_v38 }
  0x30   :  { %924 = vmatpush3.bf16.msra.mxu0 %v1044_v60 }
  0x31   :  { %925 = vmatprep.subr.bf16.mxu0 %v1046_v62  ;;  %964 = vmatpush3.bf16.msra.mxu1 %v1045_v61 }
  0x32   :  { %965 = vmatprep.subr.bf16.mxu1 %v1091_v38 }
  0x33   :  { %8 = vsyncpa [#allocation3], 0  ;;  %v1050_v2 = vld [vmem:[%s1346_s1 + $0x110] sm:$0xff]   ;;  %v1052_v3 = vld [vmem:[%s1346_s1 + $0x148] sm:$0xff]   ;;  %v160_v9 = vrot.slane %v1221_v43, %v1217_v41  ;;  %vm682_vm1 = vcmask 1041408   ;;  %s1093_s30 = smov [#allocation2]  }
  0x34   :  { %926 = vmatpush3.bf16.msra.mxu0 %v1047_v63  ;;  %v1051_v4 = vld [vmem:[%s1346_s1 + $0x190] sm:$0xff]   ;;  %v1053_v5 = vld [vmem:[%s1346_s1 + $0x108] sm:$0xff]   ;;  %v1055_v6 = vld [vmem:[%s1346_s1 + $0x140] sm:$0xff]   ;;  %s801_s4 = sshll.u32 %s1093_s30, 4  ;;  %s802_s4 = int_to_ptr.vmem [resolvable:$true] %s801_s4 }
  0x35   :  { %927 = vmatprep.subr.bf16.mxu0 %v1049_v0  ;;  %966 = vmatpush3.bf16.msra.mxu1 %v1048_v1  ;;  %v1054_v7 = vld [vmem:[%s1346_s1 + $0x188] sm:$0xff]   ;;  %v1056_v8 = vld [vmem:[%s1346_s1 + $0x100] sm:$0xff]   ;;  %v176_v11 = vcombine.high %v160_v9, %v160_v9  ;;  %v1058_v12 = vld [vmem:[%s1347_s2 + $0x38] sm:$0xff]   ;;  %s1068_s5 = scalar_lea.vmem %s802_s4, 32  ;;  %p1073_p1 = scmp.lt.s32.totalorder %s802_s4, %s802_s4 }
  0x36   :  { %967 = vmatprep.subr.bf16.mxu1 %v1091_v38  ;;  %v1057_v10 = vld [vmem:[%s1346_s1 + $0x180] sm:$0xff]   ;;  %v1059_v13 = vld [vmem:[%s1347_s2 + $0x30] sm:$0xff]   ;;  %v1060_v14 = vld [vmem:[%s1347_s2 + $0x28] sm:$0xff]   ;;  %p1069_p0 = scmp.ne.s32.totalorder %s802_s4, %s1068_s5  ;;  %p1074_p2 = scmp.lt.s32.totalorder %s1068_s5, %s1068_s5 }
  0x37   :  { %v1061_v40 = vld [vmem:[%s1347_s2 + $0x20] sm:$0xff]   ;;  %v1062_v41 = vld [vmem:[%s1347_s2 + $0x18] sm:$0xff]   ;;  %v1063_v42 = vld [vmem:[%s1347_s2 + $0x10] sm:$0xff]  }
  0x38   :  { %928 = vmatpush3.bf16.msra.mxu0 %v1050_v2  ;;  %v1064_v43 = vld [vmem:[%s1347_s2 + $0x8] sm:$0xff]   ;;  %v1065_v44 = vld [vmem:[%s1347_s2] sm:$0xff]   ;;  %p1075_p3 = por %p1074_p2, %p1073_p1 }
  0x39   :  { %929 = vmatprep.subr.bf16.mxu0 %v1052_v3  ;;  %968 = vmatpush3.bf16.msra.mxu1 %v1051_v4 }
  0x3a   :  { %969 = vmatprep.subr.bf16.mxu1 %v1091_v38  ;;  %p1076_p4 = pnand %p1075_p3, %p1069_p0 }
  0x3c   :  { %930 = vmatpush3.bf16.msra.mxu0 %v1053_v5 }
  0x3d   :  { %931 = vmatprep.subr.bf16.mxu0 %v1055_v6  ;;  %970 = vmatpush3.bf16.msra.mxu1 %v1054_v7 }
  0x3e   :  { %971 = vmatprep.subr.bf16.mxu1 %v1091_v38 }
  0x40   :  { %932 = vmatpush3.bf16.msra.mxu0 %v1056_v8 }
  0x41   :  { %977 = vmatprep.subr.bf16.mxu0 %v1091_v38  ;;  %972 = vmatpush3.bf16.msra.mxu1 %v1057_v10 }
  0x43   :  { %634 = vmatmul.mubr.bf16.vlgmr.msra.gmra.mxu0 %v160_v9 }
  0x44   :  { %993 = vmatprep.mubr.msk.bf16.mxu0 %vm1092_vm0, %v1091_v38  ;;  %974 = vmatmul.mubr.bf16.vlgmr.msra.gmra.mxu1 %v176_v11 }
  0x45   :  { %978 = vmatpush3.bf16.msra.mxu0 %v1058_v12 }
  0x46   :  { %979 = vmatprep.subr.bf16.mxu0 %v1091_v38 }
  0x49   :  { %980 = vmatpush3.bf16.msra.mxu0 %v1059_v13 }
  0x4a   :  { %981 = vmatprep.subr.bf16.mxu0 %v1091_v38 }
  0x4d   :  { %982 = vmatpush3.bf16.msra.mxu0 %v1060_v14 }
  0x4e   :  { %983 = vmatprep.subr.bf16.mxu0 %v1091_v38 }
  0x51   :  { %984 = vmatpush3.bf16.msra.mxu0 %v1061_v40 }
  0x52   :  { %985 = vmatprep.subr.bf16.mxu0 %v1091_v38 }
  0x55   :  { %986 = vmatpush3.bf16.msra.mxu0 %v1062_v41 }
  0x56   :  { %987 = vmatprep.subr.bf16.mxu0 %v1091_v38 }
  0x59   :  { %988 = vmatpush3.bf16.msra.mxu0 %v1063_v42 }
  0x5a   :  { %989 = vmatprep.subr.bf16.mxu0 %v1091_v38 }
  0x5d   :  { %990 = vmatpush3.bf16.msra.mxu0 %v1064_v43 }
  0x5e   :  { %991 = vmatprep.subr.bf16.mxu0 %v1091_v38 }
  0x61   :  { %992 = vmatpush3.bf16.msra.mxu0 %v1065_v44 }
  0xe3   :  { %v889_v15 = vpop.f32.mrf.mxu0 }
  0xe4   :  { %v911_v16 = vpop.f32.mrf.mxu1 }
  0xe5   :  { %v890_v17 = vpop.f32.mrf.mxu0 }
  0xe6   :  { %v912_v18 = vpop.f32.mrf.mxu1  ;;  %v891_v23 = vadd.f32 %v890_v17, %v889_v15 }
  0xe7   :  { %v892_v19 = vpop.f32.mrf.mxu0  ;;  %v913_v24 = vadd.f32 %v912_v18, %v911_v16 }
  0xe8   :  { %v914_v20 = vpop.f32.mrf.mxu1 }
  0xe9   :  { %v893_v21 = vpop.f32.mrf.mxu0  ;;  %v596_v28 = vadd.f32 %v913_v24, %v891_v23 }
  0xea   :  { %v915_v22 = vpop.f32.mrf.mxu1 }
 0x103   :  { %v933_v25 = vpop.f32.mrf.mxu0 }
 0x104   :  { %v675_v26 = vpop.f32.mrf.mxu1 }
 0x105   :  { %v934_v27 = vpop.f32.mrf.mxu0 }
 0x106   :  { %v935_v29 = vadd.f32 %v934_v27, %v933_v25  ;;  %v975_v30 = vpop.f32.mrf.mxu1 }
 0x107   :  { %v936_v31 = vpop.f32.mrf.mxu0 }
 0x108   :  { %v636_v32 = vadd.f32 %v935_v29, %v596_v28  ;;  %v678_v33 = vpop.f32.mrf.mxu1 }
 0x109   :  { %v937_v34 = vpop.f32.mrf.mxu0 }
 0x10a   :  { %v676_v35 = vadd.f32 %v675_v26, %v636_v32  ;;  %v976_v36 = vpop.f32.mrf.mxu1 }
 0x10c   :  { %v681_v37 = vmul.f32 %v676_v35, %v676_v35 }
 0x10e   :  { %v683_v39 = vsel %vm682_vm1, %v681_v37, 0.0 }
 0x10f   :  { %684 = vadd.xlane.f32.xlu0 %v683_v39 }
 0x198   :  { %v685_v45 = vpop.xlane.xlu0 %684 }
 0x199   :  { %v686_v46 = vadd.f32 1e-12, %v685_v45 }
 0x19b   :  { %1066 = vrsqrt.f32 %v686_v46 }
 0x1a8   :  { %v1067_v47 = vpop.eup %1066 }
 0x1a9   :  { %v688_v48 = vmul.f32 %v1067_v47, %v676_v35 }
 0x1ab   :  { %v689_v49 = vpack.c.bf16 %v688_v48, %v688_v48 }
 0x1ad   :  { %994 = vmatmul.mubr.bf16.vlgmr.msra.gmra.mxu0 %v689_v49 }
 0x26d   :  { %v788_v50 = vpop.f32.mrf.mxu0 }
 0x26e   :  { %794 = vst [vmem:[#allocation2] sm:$0x3] %v788_v50 }
 0x26f   :  { %v995_v51 = vpop.f32.mrf.mxu0 }
 0x270   :  { %1079 = shalt.err (!%p1076_p4)
}
 0x271   :  { %804 = dma.vmem_to_hbm [thread:$0]  %s802_s4, 32, %s1348_s3, [#allocation3]   ;;  %v791_v38 = vpop.f32.mrf.mxu0 }
 0x273   :  { %v996_v52 = vpop.f32.mrf.mxu0 }
 0x274   :  { %1088 = dma.done.wait [#allocation3], 32  }
 0x275   :  { %1089 = vsyncadd [#allocation3], 4294967264 }
 0x276   :  { %808 = vsyncpa [#allocation3], 1 }

</bundles_post_ra>
